<compile_context>
chip_gen: v5e
topology: v5e:2x2
jax: 0.10.0
libtpu: 0.0.40
codegen_flags: <defaults>
</compile_context>

<pallas_src>
import functools
import math

import jax
import jax.numpy as jnp
from jax import lax
from jax.experimental import pallas as pl
from jax.experimental.pallas import tpu as pltpu


def _attn_kernel(*refs, d_model, tanh_clip, has_mask):
    if has_mask:
        q_ref, e_ref, a_ref, mask_ref, o_ref = refs
    else:
        q_ref, e_ref, a_ref, o_ref = refs
        mask_ref = None

    bb, m, d = q_ref.shape
    n = e_ref.shape[1]

    # One flattened (block_b*M, d) MXU matmul performs BOTH linear layers:
    # A = W_q^T @ W_k (or just W_k), so Q @ A == (Q @ W_q^T) @ W_k, and the
    # projection lives on the (smaller) Q side instead of the K side.
    q2 = q_ref[...].reshape(bb * m, d)
    qa = lax.dot_general(q2, a_ref[...], (((1,), (0,)), ((), ())),
                         preferred_element_type=jnp.float32)       # (Bb*M, d)
    qa = qa.astype(q_ref.dtype).reshape(bb, m, d)

    # logits[b, q, k] = sum_d qa[b, q, d] * E[b, k, d]   ('bqd,bkd->bqk')
    logits = lax.dot_general(qa, e_ref[...], (((2,), (2,)), ((0,), (0,))),
                             preferred_element_type=jnp.float32)   # (Bb, M, N)

    if len(o_ref.shape) == 2:
        # Lane-dense output layout: (Bb, M, N) -> (Bb, M*N) so the epilogue
        # VPU/EUP work and the stores run on full 128-lane vregs.
        logits = logits.reshape(bb, m * n)

    logits = logits * (1.0 / math.sqrt(d_model))
    if tanh_clip > 0:
        logits = jnp.tanh(logits) * tanh_clip
    if has_mask:
        # masked_fill(mask, -inf); mask ships in the same layout as the output.
        logits = jnp.where(mask_ref[...] != 0, -jnp.inf, logits)

    o_ref[...] = logits.astype(o_ref.dtype)


def single_head_attention_cache_k(q_embed, embed, w_k, w_q=None, mask=None, *,
                                  tanh_clip=10.0, use_query_proj=False,
                                  block_b=None, compute_dtype=jnp.bfloat16,
                                  out_dtype=jnp.float32, lane_dense_out=None):
    """Fused init() + forward() of SingleHeadAttentionCacheK.

    q_embed: (B, M, d)  float32           forward() input
    embed:   (B, N, d)  float32           init() input
    w_k:     (d, d)     float32           nn.Linear weight (y = x @ W^T)
    w_q:     (d, d)     float32           only used if use_query_proj
    mask:    (B, M, N)  bool/int or None  nonzero = masked (-inf)
    returns: (B, M, N)  out_dtype logits

    compute_dtype: dtype fed to the MXU (bf16 default, f32 accumulation);
                   pass jnp.float32 for closest PyTorch parity.
    lane_dense_out: None (auto) / True / False — flatten (M, N) -> M*N lanes
                   per batch row for dense stores when N is not 128-aligned.
    """
    B, M, d = q_embed.shape
    _, N, _ = embed.shape
    MN = M * N

    # ---- Fold init() + forward() weights into a single (d, d) matrix -------
    # logits = Q_proj @ K^T = Q @ W_q^T @ W_k @ E^T   =>   A = W_q^T @ W_k.
    if use_query_proj:
        if w_q is None:
            raise ValueError("use_query_proj=True requires w_q")
        a_mat = jnp.dot(w_q.T, w_k, precision=jax.lax.Precision.HIGHEST)
    else:
        a_mat = w_k

    cd = jnp.dtype(compute_dtype)
    a_mat = a_mat.astype(cd)
    q_c = q_embed.astype(cd)      # cast once in the wrapper: halves HBM reads
    e_c = embed.astype(cd)        # for bf16 and removes per-step VPU recasts

    has_mask = mask is not None

    # Lane-dense output only pays when N is lane-sparse and the batch block
    # can be a multiple of 8 sublanes while keeping >= 2 grid steps.
    if lane_dense_out is None:
        lane_dense_out = (N % 128 != 0) and (M > 1) and (B >= 16)

    if has_mask:
        if lane_dense_out:
            mask_k = (mask != 0).astype(jnp.int32).reshape(B, MN)
        else:
            mask_k = (mask != 0).astype(jnp.int8)

    # ---- Per-generation VMEM budget & batch-block size ----------------------
    try:
        vmem_cap = int(getattr(pltpu.get_tpu_info(), "vmem_capacity_bytes",
                               64 << 20))
    except Exception:
        vmem_cap = 64 << 20
    # ~35 MiB on v7x (64 MiB physical), ~70 MiB on v5e/v6e (128 MiB physical).
    vmem_limit = int(max(24 << 20, min(vmem_cap * 0.55, 96 << 20)))

    if block_b is None:
        cb, ob = cd.itemsize, jnp.dtype(out_dtype).itemsize
        per_b = (2 * cb * (M + N) * d              # q / e blocks (2x buffered)
                 + 2 * ob * MN                     # output block (2x buffered)
                 + (2 * 4 * MN if has_mask else 0)  # mask block (2x buffered)
                 + (4 + cb) * M * d                # Q@A f32 temp + recast copy
                 + 2 * 4 * MN)                     # f32 logits (+ flat copy)
        fixed = 2 * cb * d * d + (1 << 20)         # weights (2x) + headroom
        block_b = max(1, (int(vmem_limit * 0.7) - fixed) // max(per_b, 1))
    block_b = max(1, min(block_b, B))
    if B >= 2:
        # Keep >= 2 grid steps so dimension_semantics=("parallel",) can shard
        # the batch axis across v7x's 2 TensorCores (harmless on 1-TC gens).
        block_b = min(block_b, pl.cdiv(B, 2))
    if lane_dense_out:
        # Batch is the second-minor dim of the flattened output/mask arrays:
        # keep the block a multiple of 8 sublanes.
        block_b = max(8, (block_b // 8) * 8)

    # Ragged B: pad to a multiple of block_b instead of degrading block_b -> 1.
    num_blocks = pl.cdiv(B, block_b)
    B_pad = num_blocks * block_b
    if B_pad != B:
        pad = B_pad - B
        q_c = jnp.pad(q_c, ((0, pad), (0, 0), (0, 0)))
        e_c = jnp.pad(e_c, ((0, pad), (0, 0), (0, 0)))
        if has_mask:
            mask_k = jnp.pad(mask_k,
                             ((0, pad),) + ((0, 0),) * (mask_k.ndim - 1))

    kernel = functools.partial(_attn_kernel, d_model=d,
                               tanh_clip=float(tanh_clip), has_mask=has_mask)

    in_specs = [
        pl.BlockSpec((block_b, M, d), lambda b: (b, 0, 0)),   # q_embed
        pl.BlockSpec((block_b, N, d), lambda b: (b, 0, 0)),   # embed
        pl.BlockSpec((d, d), lambda b: (0, 0)),               # fused weights A
    ]
    args = [q_c, e_c, a_mat]
    if has_mask:
        if lane_dense_out:
            in_specs.append(pl.BlockSpec((block_b, MN), lambda b: (b, 0)))
        else:
            in_specs.append(pl.BlockSpec((block_b, M, N), lambda b: (b, 0, 0)))
        args.append(mask_k)

    if lane_dense_out:
        out_shape = jax.ShapeDtypeStruct((B_pad, MN), out_dtype)
        out_specs = pl.BlockSpec((block_b, MN), lambda b: (b, 0))
    else:
        out_shape = jax.ShapeDtypeStruct((B_pad, M, N), out_dtype)
        out_specs = pl.BlockSpec((block_b, M, N), lambda b: (b, 0, 0))

    out = pl.pallas_call(
        kernel,
        out_shape=out_shape,
        grid_spec=pltpu.PrefetchScalarGridSpec(
            num_scalar_prefetch=0,
            grid=(num_blocks,),
            in_specs=in_specs,
            out_specs=out_specs,
        ),
        compiler_params=pltpu.CompilerParams(
            dimension_semantics=("parallel",),
            vmem_limit_bytes=vmem_limit,
        ),
    )(*args)

    if B_pad != B:
        out = out[:B]
    return out.reshape(B, M, N)


def _reference(q_embed, embed, w_k, w_q, mask, *, tanh_clip, use_query_proj):
    """Plain-JAX reference mirroring the PyTorch module (f32 throughout)."""
    d = q_embed.shape[-1]
    glimpse_k = jnp.einsum("bnd,ed->bne", embed, w_k)          # (B, N, d)
    glimpse_k = jnp.swapaxes(glimpse_k, -2, -1)                # (B, d, N)
    q = q_embed
    if use_query_proj:
        q = jnp.einsum("bmd,ed->bme", q, w_q)
    logits = jnp.matmul(q, glimpse_k) / math.sqrt(d)
    if tanh_clip > 0:
        logits = jnp.tanh(logits) * tanh_clip
    if mask is not None:
        logits = jnp.where(mask != 0, -jnp.inf, logits)
    return logits


if __name__ == "__main__":
    B, M, N, d_model = 2, 8, 16, 32
    tanh_clip = 10.0

    key = jax.random.PRNGKey(0)
    k1, k2, k3, k4, k5 = jax.random.split(key, 5)

    # nn.Linear(d, d, bias=False) default init: U(-1/sqrt(d), 1/sqrt(d))
    bound = 1.0 / math.sqrt(d_model)
    w_k = jax.random.uniform(k1, (d_model, d_model), jnp.float32, -bound, bound)
    w_q = jax.random.uniform(k2, (d_model, d_model), jnp.float32, -bound, bound)

    embed = jax.random.normal(k3, (B, N, d_model), jnp.float32)    # init() input
    q_embed = jax.random.normal(k4, (B, M, d_model), jnp.float32)  # forward() input
    mask = (jax.random.uniform(k5, (B, M, N)) < 0.2).astype(jnp.int8)

    ref = _reference(q_embed, embed, w_k, w_q, mask,
                     tanh_clip=tanh_clip, use_query_proj=True)
    finite = mask == 0

    # Tolerances are generous because the fused (W_q^T @ W_k) reassociation and
    # the MXU precision mode move rounding points; tanh_clip bounds all finite
    # logits to |.| <= 10, so structural errors would be O(1)-O(10).
    TOL_BF16, TOL_F32 = 2e-1, 5e-2

    # Default (bf16 MXU inputs, f32 accumulation).
    out = single_head_attention_cache_k(
        q_embed, embed, w_k, w_q, mask,
        tanh_clip=tanh_clip, use_query_proj=True)
    out = jax.block_until_ready(out)
    assert out.shape == (B, M, N)
    assert bool(jnp.all(jnp.where(finite, jnp.abs(out - ref) < TOL_BF16, True)))
    assert bool(jnp.all(jnp.where(~finite, jnp.isneginf(out), True)))

    # Full-f32 compute path.
    out32 = single_head_attention_cache_k(
        q_embed, embed, w_k, w_q, mask,
        tanh_clip=tanh_clip, use_query_proj=True,
        compute_dtype=jnp.float32)
    out32 = jax.block_until_ready(out32)
    assert bool(jnp.all(jnp.where(finite, jnp.abs(out32 - ref) < TOL_F32, True)))
    assert bool(jnp.all(jnp.where(~finite, jnp.isneginf(out32), True)))

    # use_query_proj=False and mask=None (mask input statically elided).
    ref_np = _reference(q_embed, embed, w_k, w_q, None,
                        tanh_clip=tanh_clip, use_query_proj=False)
    out_np = single_head_attention_cache_k(
        q_embed, embed, w_k, None, None,
        tanh_clip=tanh_clip, use_query_proj=False,
        compute_dtype=jnp.float32)
    out_np = jax.block_until_ready(out_np)
    assert bool(jnp.all(jnp.abs(out_np - ref_np) < TOL_F32))

    # Ragged batch (B=3) exercises the padded-B path.
    q3 = jax.random.normal(jax.random.PRNGKey(1), (3, M, d_model), jnp.float32)
    e3 = jax.random.normal(jax.random.PRNGKey(2), (3, N, d_model), jnp.float32)
    m3 = jax.random.uniform(jax.random.PRNGKey(3), (3, M, N)) < 0.2
    ref3 = _reference(q3, e3, w_k, w_q, m3,
                      tanh_clip=tanh_clip, use_query_proj=True)
    out3 = single_head_attention_cache_k(
        q3, e3, w_k, w_q, m3,
        tanh_clip=tanh_clip, use_query_proj=True, compute_dtype=jnp.float32)
    out3 = jax.block_until_ready(out3)
    fin3 = ~m3
    assert out3.shape == (3, M, N)
    assert bool(jnp.all(jnp.where(fin3, jnp.abs(out3 - ref3) < TOL_F32, True)))
    assert bool(jnp.all(jnp.where(~fin3, jnp.isneginf(out3), True)))

    # Larger batch exercising the lane-dense flattened output/mask layout and
    # the multiple-of-8 batch block.  If this Mosaic build cannot lower the
    # in-kernel (M, N) -> (M*N,) relayout, fall back to the 3-D layout.
    Bb = 32
    qb = jax.random.normal(jax.random.PRNGKey(4), (Bb, M, d_model), jnp.float32)
    eb = jax.random.normal(jax.random.PRNGKey(5), (Bb, N, d_model), jnp.float32)
    mb = jax.random.uniform(jax.random.PRNGKey(6), (Bb, M, N)) < 0.2
    refb = _reference(qb, eb, w_k, w_q, mb,
                      tanh_clip=tanh_clip, use_query_proj=True)
    try:
        outb = single_head_attention_cache_k(
            qb, eb, w_k, w_q, mb,
            tanh_clip=tanh_clip, use_query_proj=True, compute_dtype=jnp.float32)
        outb = jax.block_until_ready(outb)
    except Exception:
        outb = single_head_attention_cache_k(
            qb, eb, w_k, w_q, mb,
            tanh_clip=tanh_clip, use_query_proj=True, compute_dtype=jnp.float32,
            lane_dense_out=False)
        outb = jax.block_until_ready(outb)
    finb = ~mb
    assert outb.shape == (Bb, M, N)
    assert bool(jnp.all(jnp.where(finb, jnp.abs(outb - refb) < TOL_F32, True)))
    assert bool(jnp.all(jnp.where(~finb, jnp.isneginf(outb), True)))

    print("KERNEL_OK")
</pallas_src>

<mosaic_0001>
module attributes {stable_mosaic.version = 11 : i64} {
  func.func @_attn_kernel(%arg0: i32, %arg1: memref<1x8x32xbf16, #tpu.memory_space<vmem>>, %arg2: memref<1x16x32xbf16, #tpu.memory_space<vmem>>, %arg3: memref<32x32xbf16, #tpu.memory_space<vmem>>, %arg4: memref<1x8x16xi8, #tpu.memory_space<vmem>>, %arg5: memref<1x8x16xf32, #tpu.memory_space<vmem>>) attributes {dimension_semantics = [#tpu.dimension_semantics<parallel>], iteration_bounds = array<i64: 2>, scalar_prefetch = 0 : i64, scratch_operands = 0 : i64, tpu.core_type = #tpu.core_type<tc>, window_params = [{transform_indices = @transform_0, window_bounds = array<i64: 1, 8, 32>}, {transform_indices = @transform_1, window_bounds = array<i64: 1, 16, 32>}, {pipeline_mode = #tpu.pipeline_mode<synchronous>, transform_indices = @transform_2, window_bounds = array<i64: 32, 32>}, {transform_indices = @transform_3, window_bounds = array<i64: 1, 8, 16>}, {transform_indices = @transform_4, window_bounds = array<i64: 1, 8, 16>}]} {
    %c0 = arith.constant 0 : index
    %c0_0 = arith.constant 0 : index
    %c0_1 = arith.constant 0 : index
    %0 = vector.load %arg1[%c0, %c0_0, %c0_1] : memref<1x8x32xbf16, #tpu.memory_space<vmem>>, vector<1x8x32xbf16>
    %1 = vector.shape_cast %0 : vector<1x8x32xbf16> to vector<8x32xbf16>
    %c0_2 = arith.constant 0 : index
    %c0_3 = arith.constant 0 : index
    %2 = vector.load %arg3[%c0_2, %c0_3] : memref<32x32xbf16, #tpu.memory_space<vmem>>, vector<32x32xbf16>
    %cst = arith.constant dense<0.000000e+00> : vector<8x32xf32>
    %3 = tpu.matmul %1, %2, %cst {dimension_numbers = #tpu.dot_dimension_numbers<[1], [0], [0], [1], [0, 0, 1, 1], [], []>} : vector<8x32xbf16>, vector<32x32xbf16>, vector<8x32xf32> -> vector<8x32xf32>
    %4 = arith.truncf %3 : vector<8x32xf32> to vector<8x32xbf16>
    %5 = vector.shape_cast %4 : vector<8x32xbf16> to vector<1x8x32xbf16>
    %c0_4 = arith.constant 0 : index
    %c0_5 = arith.constant 0 : index
    %c0_6 = arith.constant 0 : index
    %6 = vector.load %arg2[%c0_4, %c0_5, %c0_6] : memref<1x16x32xbf16, #tpu.memory_space<vmem>>, vector<1x16x32xbf16>
    %cst_7 = arith.constant dense<0.000000e+00> : vector<1x8x16xf32>
    %7 = tpu.matmul %5, %6, %cst_7 {dimension_numbers = #tpu.dot_dimension_numbers<[2], [2], [1], [1], [0, 0, 0, 1, 1, 1], [0], [0]>} : vector<1x8x32xbf16>, vector<1x16x32xbf16>, vector<1x8x16xf32> -> vector<1x8x16xf32>
    %cst_8 = arith.constant 0.176776692 : f32
    %8 = vector.broadcast %cst_8 : f32 to vector<1x8x16xf32>
    %9 = arith.mulf %7, %8 : vector<1x8x16xf32>
    %10 = math.tanh %9 : vector<1x8x16xf32>
    %cst_9 = arith.constant 1.000000e+01 : f32
    %11 = vector.broadcast %cst_9 : f32 to vector<1x8x16xf32>
    %12 = arith.mulf %10, %11 : vector<1x8x16xf32>
    %c0_10 = arith.constant 0 : index
    %c0_11 = arith.constant 0 : index
    %c0_12 = arith.constant 0 : index
    %13 = vector.load %arg4[%c0_10, %c0_11, %c0_12] : memref<1x8x16xi8, #tpu.memory_space<vmem>>, vector<1x8x16xi8>
    %c0_i8 = arith.constant 0 : i8
    %14 = vector.broadcast %c0_i8 : i8 to vector<1x8x16xi8>
    %15 = arith.cmpi ne, %13, %14 : vector<1x8x16xi8>
    %cst_13 = arith.constant 0xFF800000 : f32
    %16 = vector.broadcast %cst_13 : f32 to vector<1x8x16xf32>
    %17 = arith.select %15, %16, %12 : vector<1x8x16xi1>, vector<1x8x16xf32>
    %c0_14 = arith.constant 0 : index
    %c0_15 = arith.constant 0 : index
    %c0_16 = arith.constant 0 : index
    %18 = vector.load %arg5[%c0_14, %c0_15, %c0_16] : memref<1x8x16xf32, #tpu.memory_space<vmem>>, vector<1x8x16xf32>
    tpu.vector_store %arg5[%c0_14, %c0_15, %c0_16], %17 {strides = array<i32>} : memref<1x8x16xf32, #tpu.memory_space<vmem>>, vector<1x8x16xf32>,
    return
  }
  func.func @transform_0(%arg0: i32) -> (i32, i32, i32) {
    %c0_i32 = arith.constant 0 : i32
    %c0_i32_0 = arith.constant 0 : i32
    %c0_i32_1 = arith.constant 0 : i32
    return %arg0, %c0_i32, %c0_i32_0 : i32, i32, i32
  }
  func.func @transform_1(%arg0: i32) -> (i32, i32, i32) {
    %c0_i32 = arith.constant 0 : i32
    %c0_i32_0 = arith.constant 0 : i32
    %c0_i32_1 = arith.constant 0 : i32
    return %arg0, %c0_i32, %c0_i32_0 : i32, i32, i32
  }
  func.func @transform_2(%arg0: i32) -> (i32, i32) {
    %c0_i32 = arith.constant 0 : i32
    %c0_i32_0 = arith.constant 0 : i32
    %c0_i32_1 = arith.constant 0 : i32
    return %c0_i32, %c0_i32_0 : i32, i32
  }
  func.func @transform_3(%arg0: i32) -> (i32, i32, i32) {
    %c0_i32 = arith.constant 0 : i32
    %c0_i32_0 = arith.constant 0 : i32
    %c0_i32_1 = arith.constant 0 : i32
    return %arg0, %c0_i32, %c0_i32_0 : i32, i32, i32
  }
  func.func @transform_4(%arg0: i32) -> (i32, i32, i32) {
    %c0_i32 = arith.constant 0 : i32
    %c0_i32_0 = arith.constant 0 : i32
    %c0_i32_1 = arith.constant 0 : i32
    return %arg0, %c0_i32, %c0_i32_0 : i32, i32, i32
  }
}

</mosaic_0001>

<bundles_post_ra>
// kernel: tpu_custom_call.1
= control target key start
LH: loop header
LB: loop body
LE: loop exit
PB: predicated region body
PF: predicated region fallthrough
CT: control target
= control target key end

     0   :  { %s1073_s0 = inlined_call_operand.hbm [shape: bf16[2,8,32], index: 0, kind: input, shape index: {}]   ;;  %s1074_s1 = inlined_call_operand.hbm [shape: bf16[2,16,32], index: 1, kind: input, shape index: {}]   ;;  %s1075_s2 = inlined_call_operand.hbm [shape: bf16[32,32], index: 2, kind: input, shape index: {}]   ;;  %s1076_s3 = inlined_call_operand.hbm [shape: s8[2,8,16], index: 3, kind: input, shape index: {}]   ;;  %s1077_s4 = inlined_call_operand.hbm [shape: f32[2,8,16], index: 4, kind: output, shape index: {}]  }
   0x1   :  { %1081 = sst [smem:[#allocation18_spill]] %s1075_s2 }
   0x2   :  { %9 = vsyncpa [#allocation3], 0 }
   0x3   :  { %11 = vsyncpa [#allocation3 + $0x1], 0 }
   0x4   :  { %12 = vsyncpa [#allocation6], 0 }
   0x5   :  { %14 = vsyncpa [#allocation6 + $0x1], 0 }
   0x6   :  { %15 = vsyncpa [#allocation9], 0 }
   0x7   :  { %17 = vsyncpa [#allocation9 + $0x1], 0 }
   0x8   :  { %18 = vsyncpa [#allocation4], 0 }
   0x9   :  { %20 = vsyncpa [#allocation4 + $0x1], 0  ;;  %s868_s15 = smov 0   ;;  %s870_s16 = smov 0  }
   0xa   :  { %s872_s17 = smov 0   ;;  %s874_s18 = smov 0  }
   0xb LB: > { %1082 = sst [smem:[#allocation16_spill]] %s833_s17  ;;  %s892_s22 = sadd.s32 4294967295, %s837_s18   ;;  %s837_s18 = sphi %s874_s18, %s1098_s18   ;;  %s833_s17 = sphi %s872_s17, %s1095_s17   ;;  %s829_s16 = sphi %s870_s16, %s1097_s16   ;;  %s825_s15 = sphi %s868_s15, %s1096_s15  }
   0xc   : > { %s1083_s2 = sld [smem:[#allocation18_spill]]  ;;  %p529_p0 = scmp.ge.s32.totalorder %s837_s18, 1 }
   0xd   : > { %p47_p1 = scmp.eq.s32.totalorder %s892_s22, 0  ;;  %p156_p2 = scmp.lt.s32.totalorder %s837_s18, 3 }
   0xe   : > { %s839_s24 = smov [#allocation7]   ;;  %s1078_s26 = smov 64  }
   0xf   : > { %p897_p3 = pnand %p529_p0, %p156_p2  ;;  %s169_s25 = sshll.u32 %s839_s24, 4  ;;  %s170_s25 = int_to_ptr.vmem [resolvable:$true] %s169_s25 }
  0x10   : > { %s1079_s27 = smov 4   ;;  %s528_s28 = sadd.s32 4294967294, %s837_s18  }
  0x11   : > { %p579_p4 = pneg %p897_p3  ;;  %s911_s29 = sadd.s32 1, %s837_s18  }
  0x12   : > { %s167_s21 = sshll.u32 %s1083_s2, 4  ;;  %s33_s30 = sadd.s32 1, %s833_s17  ;;  %s168_s21 = int_to_ptr.hbm [resolvable:$true] %s167_s21 }
  0x13   : > { %p580_p6 = pnand %p579_p4, %p47_p1  ;;  %s30_s5 = ssub.s32 %s837_s18, %s911_s29 }
  0x14   : > { %p40_p7 = scmp.ne.s32.totalorder %s833_s17, %s829_s16  ;;  %p31_p8 = scmp.eq.s32.totalorder %s30_s5, 0 }
  0x15   : > { %582 = dma.hbm_to_vmem [thread:$0]  (!%p580_p6), %s168_s21, 256, %s170_s25, [#allocation6], %s1078_s26, %s1078_s26, %s1079_s27  }
  0x16   : > { %p41_p9 = scmp.eq.s32.totalorder %s837_s18, 0  ;;  %p46_p10 = scmp.ne.s32.totalorder %s829_s16, %s825_s15 }
  0x17   : > { %p143_p11 = scmp.eq.s32.totalorder %s892_s22, 1  ;;  %p149_p2 = scmp.eq.s32.totalorder %s528_s28, 1 }
  0x18   : > { %s923_s6 = scalar_select %p31_p8, %s833_s17, %s33_s30  }
  0x19   : > { %p925_p12 = por %p41_p9, %p40_p7  ;;  %p931_p13 = por %p47_p1, %p46_p10 }
  0x1a   : > { %1085 = sst [smem:[#allocation17_spill]] %s923_s6  ;;  %p935_p0 = por %p143_p11, %p40_p7 }
  0x1b   : > { %p598_p4 = scmp.lt.s32.totalorder %s837_s18, 2  ;;  %s941_s10 = sand.u32 1, %s833_s17  }
  0x1c   : > { %p943_p6 = por %p149_p2, %p46_p10  ;;  %s532_s12 = sshll.u32 %s941_s10, 2 }
  0x1d   : > { %s533_s13 = sshll.u32 %s837_s18, 2  ;;  %s187_s24 = scalar_lea.vmem [#allocation2], %s532_s12 }
  0x1e   : > { %s191_s20 = scalar_lea.hbm %s1073_s0, %s533_s13  ;;  %s195_s25 = sshll.u32 %s187_s24, 4  ;;  %s196_s25 = int_to_ptr.vmem [resolvable:$true] %s195_s25 }
  0x1f   : > { %s193_s21 = sshll.u32 %s191_s20, 4  ;;  %p954_p7 = pnand %p598_p4, %p925_p12  ;;  %s194_s21 = int_to_ptr.hbm [resolvable:$true] %s193_s21 }
  0x20   : > { %s202_s30 = sand.u32 1, %s837_s18   ;;  %s534_s5 = sshll.u32 %s941_s10, 3 }
  0x21   : > { %s184_s26 = scalar_lea.sflag [#allocation3], %s941_s10  ;;  %s669_s27 = sshra.s32 %s194_s21, 4  ;;  %s670_s27 = int_to_ptr.hbm [resolvable:$true] %s669_s27 }
  0x22   : > { %s671_s2 = scalar_lea.hbm %s670_s27, 4  ;;  %p673_p9 = pneg %p954_p7 }
  0x23   : > { %p672_p8 = scmp.ne.s32.totalorder %s670_s27, %s671_s2  ;;  %s676_s13 = scalar_lea.hbm %s1073_s0, 8 }
  0x24   : > { %p677_p12 = scmp.lt.s32.totalorder %s670_s27, %s1073_s0  ;;  %p678_p2 = scmp.lt.s32.totalorder %s676_s13, %s671_s2 }
  0x25   : > { %p674_p10 = pnand %p673_p9, %p672_p8 }
  0x26   : > { %p679_p4 = por %p678_p2, %p677_p12 }
  0x27   : > { %p675_p11 = pneg %p674_p10 }
  0x29   : > { %p680_p5 = pnand %p679_p4, %p675_p11 }
  0x2b   : > { %683 = shalt.err (!%p680_p5)
}
  0x2c   : > { %586 = dma.hbm_to_vmem [thread:$0]  (!%p954_p7), %s194_s21, 64, %s196_s25, %s184_s26  }
  0x2d   : > { %s563_s20 = sshll.u32 %s837_s18, 3  ;;  %s206_s24 = scalar_lea.vmem [#allocation5], %s534_s5 }
  0x2e   : > { %s214_s6 = sshll.u32 %s206_s24, 4  ;;  %s211_s12 = scalar_lea.hbm %s1074_s1, %s563_s20  ;;  %s215_s6 = int_to_ptr.vmem [resolvable:$true] %s214_s6 }
  0x2f   : > { %s212_s14 = sshll.u32 %s211_s12, 4  ;;  %s537_s2 = sshll.u32 %s941_s10, 1  ;;  %s213_s14 = int_to_ptr.hbm [resolvable:$true] %s212_s14 }
  0x30   : > { %s203_s27 = scalar_lea.sflag [#allocation6], %s202_s30  ;;  %s699_s13 = sshra.s32 %s213_s14, 4  ;;  %s700_s13 = int_to_ptr.hbm [resolvable:$true] %s699_s13 }
  0x31   : > { %s701_s19 = scalar_lea.hbm %s700_s13, 8  ;;  %s706_s25 = scalar_lea.hbm %s1074_s1, 16 }
  0x32   : > { %p702_p5 = scmp.ne.s32.totalorder %s700_s13, %s701_s19  ;;  %p707_p11 = scmp.lt.s32.totalorder %s700_s13, %s1074_s1 }
  0x33   : > { %p708_p12 = scmp.lt.s32.totalorder %s706_s25, %s701_s19 }
  0x34   : > { %p704_p8 = pnand %p702_p5, %p673_p9 }
  0x35   : > { %p709_p2 = por %p708_p12, %p707_p11 }
  0x36   : > { %p705_p10 = pneg %p704_p8 }
  0x38   : > { %p710_p4 = pnand %p709_p2, %p705_p10 }
  0x3a   : > { %713 = shalt.err (!%p710_p4)
}
  0x3b   : > { %s1091_s30 = smov 4   ;;  %s1092_s20 = smov 64  }
  0x3c   : > { %589 = dma.hbm_to_vmem [thread:$0]  (!%p954_p7), %s213_s14, 128, %s215_s6, %s203_s27, %s1092_s20, %s1092_s20, %s1091_s30  }
  0x3d   : > { %s538_s24 = sshll.u32 %s837_s18, 1  ;;  %s228_s21 = scalar_lea.vmem [#allocation8], %s537_s2 }
  0x3e   : > { %s232_s26 = scalar_lea.hbm %s1076_s3, %s538_s24  ;;  %s236_s13 = sshll.u32 %s228_s21, 4  ;;  %s237_s13 = int_to_ptr.vmem [resolvable:$true] %s236_s13 }
  0x3f   : > { %s234_s19 = sshll.u32 %s232_s26, 4  ;;  %s225_s25 = scalar_lea.sflag [#allocation9], %s941_s10  ;;  %s235_s19 = int_to_ptr.hbm [resolvable:$true] %s234_s19 }
  0x40   : > { %s729_s5 = sshra.s32 %s235_s19, 4  ;;  %s736_s27 = scalar_lea.hbm %s1076_s3, 4  ;;  %s730_s5 = int_to_ptr.hbm [resolvable:$true] %s729_s5 }
  0x41   : > { %s731_s17 = scalar_lea.hbm %s730_s5, 2  ;;  %p737_p11 = scmp.lt.s32.totalorder %s730_s5, %s1076_s3 }
  0x42   : > { %p732_p5 = scmp.ne.s32.totalorder %s730_s5, %s731_s17  ;;  %p738_p12 = scmp.lt.s32.totalorder %s736_s27, %s731_s17 }
  0x44   : > { %p734_p8 = pnand %p732_p5, %p673_p9  ;;  %p739_p2 = por %p738_p12, %p737_p11 }
  0x46   : > { %p735_p10 = pneg %p734_p8 }
  0x48   : > { %p740_p4 = pnand %p739_p2, %p735_p10 }
  0x4a   : > { %743 = shalt.err (!%p740_p4)
}
  0x4b   : > { %592 = dma.hbm_to_vmem [thread:$0]  (!%p954_p7), %s235_s19, 32, %s237_s13, %s225_s25  }
  0x4c   : > { %245 = sbr.rel (%p897_p3) target bundleno = 367 (0x16f), region = 36  ;;  %s1012_s10 = sand.u32 (!%p897_p3), 1, %s829_s16  }
  0x4d   : > { %s540_s2 = sshll.u32 (!%p897_p3), %s1012_s10, 2  ;;  %s248_s24 = scalar_lea.sflag (!%p897_p3), [#allocation3], %s1012_s10 }
  0x4e   : > { %s251_s7 = scalar_lea.vmem (!%p897_p3), [#allocation2], %s540_s2 }
  0x51   : > { %804 = dma.done.wait (%p931_p13), %s248_s24, 64  }
  0x52   : > { %806 = vsyncadd (%p931_p13), %s248_s24, 4294967232  ;;  %s257_s23 = sand.u32 1, %s892_s22   ;;  %s541_s28 = sshll.u32 %s1012_s10, 3 }
  0x53   : > { %s258_s12 = scalar_lea.sflag [#allocation6], %s257_s23  ;;  %s261_s26 = scalar_lea.vmem [#allocation5], %s541_s28 }
  0x54   : > { %808 = dma.done.wait (%p931_p13), %s258_s12, 128  }
  0x55   : > { %810 = vsyncadd (%p931_p13), %s258_s12, 4294967168 }
  0x56   : > { %812 = dma.done.wait (%p47_p1), [#allocation6], 256  }
  0x57   : > { %814 = vsyncadd (%p47_p1), [#allocation6], 4294967040  ;;  %s543_s21 = sshll.u32 %s1012_s10, 1  ;;  %s273_s13 = scalar_lea.sflag [#allocation9], %s1012_s10 }
  0x58   : > { %s276_s19 = scalar_lea.vmem [#allocation8], %s543_s21 }
  0x59   : > { %816 = dma.done.wait (%p931_p13), %s273_s13, 32  }
  0x5a   : > { %818 = vsyncadd (%p931_p13), %s273_s13, 4294967264  ;;  %v565_v0 = vld [vmem:[#allocation7 + $0x8] sm:$0xff]  ;;  %v566_v1 = vld [vmem:[%s261_s26] sm:$0xff]  ;;  %vm332_vm0 = vcmask 261120   ;;  %v842_v11 = vmov 0   ;;  %s560_s8 = sshll.u32 %s892_s22, 3 }
  0x5b   : > { %342 = vmatpush.bf16.msra.mxu0 %v565_v0  ;;  %v564_v2 = vld [vmem:[#allocation7] sm:$0xff]  ;;  %v361_v3 = vsel %vm332_vm0, %v566_v1, 0  ;;  %v315_v4 = vld [vmem:[%s251_s7] sm:$0xf]  ;;  %v379_v8 = vld [vmem:[%s276_s19] sm:$0x3]  ;;  %s398_s17 = scalar_lea.hbm %s1077_s4, %s560_s8 }
  0x5c   : > { %370 = vmatpush.bf16.xpose.msra.mxu1 %v361_v3  ;;  %vm380_vm1 = vnez %v379_v8  ;;  %s311_s6 = scalar_lea.vmem [#allocation10], %s541_s28  ;;  %s402_s27 = sshll.u32 %s398_s17, 4  ;;  %vm385_vm3 = vcmask 130048   ;;  %s403_s27 = int_to_ptr.hbm [resolvable:$true] %s402_s27 }
  0x5d   : > { %v381_v12 = vsel %vm380_vm1, 16843009, %v842_v11  ;;  %s400_s14 = sshll.u32 %s311_s6, 4  ;;  %s388_s22 = scalar_lea.sflag [#allocation4], %s1012_s10  ;;  %s401_s14 = int_to_ptr.vmem [resolvable:$true] %s400_s14 }
  0x5e   : > { %v382_v13 = vunpack.c.0.s8 %v381_v12  ;;  %s773_s30 = sshra.s32 %s403_s27, 4  ;;  %s779_s7 = scalar_lea.hbm %s1077_s4, 16  ;;  %s774_s30 = int_to_ptr.hbm [resolvable:$true] %s773_s30 }
  0x5f   : > { %343 = vmatpush.bf16.msra.mxu0 %v564_v2  ;;  %s775_s20 = scalar_lea.hbm %s774_s30, 8  ;;  %p780_p7 = scmp.lt.s32.totalorder %s774_s30, %s1077_s4 }
  0x60   : > { %vm383_vm2 = vcmp.ne.s32.totalorder %v382_v13, 0  ;;  %p776_p1 = scmp.ne.s32.totalorder %s774_s30, %s775_s20  ;;  %p781_p9 = scmp.lt.s32.totalorder %s779_s7, %s775_s20 }
  0x62   : > { %553 = vmatmul.msk.bf16.vlgmr.msra.gmra.mxu0 %vm332_vm0, %v315_v4  ;;  %p777_p3 = pnand %p776_p1, %p935_p0  ;;  %p782_p5 = por %p781_p9, %p780_p7 }
  0x64   : > { %p778_p13 = pneg %p777_p3 }
  0x66   : > { %p783_p8 = pnand %p782_p5, %p778_p13 }
  0xdf   : > { %v345_v5 = vpop.f32.mrf.mxu0 }
  0xe0   : > { %v349_v6 = vpack.c.bf16 %v345_v5, %v345_v5 }
  0xe2   : > { %558 = vmatmul.msk.bf16.vlgmr.msra.gmra.mxu1 %vm332_vm0, %v349_v6 }
  0xe7   : > { %v347_v7 = vpop.f32.mrf.mxu0 }
 0x15f   : > { %v372_v9 = vpop.f32.mrf.mxu1 }
 0x160   : > { %v376_v10 = vmul.f32 0.17677669, %v372_v9 }
 0x162   : > { %637 = vtanh.f32 %v376_v10 }
 0x167   : > { %v374_v14 = vpop.f32.mrf.mxu1 }
 0x168   : > { %v638_v15 = vpop.eup %637 }
 0x169   : > { %v378_v16 = vmul.f32 10.0, %v638_v15 }
 0x16b   : > { %v384_v17 = vsel %vm383_vm2, -inf, %v378_v16 }
 0x16c   : > { %386 = vst.msk [vmem:[%s311_s6] sm:$0xff] %vm385_vm3, %v384_v17 }
 0x16d   : > { %786 = shalt.err (!%p783_p8)
}
 0x16e   : > { %577 = dma.vmem_to_hbm [thread:$0]  (%p935_p0), %s401_s14, 128, %s403_s27, %s388_s22  }
 0x16f PF: > { %s414_s10 = sand.u32 1, %s825_s15   ;;  %p1093_p10 = scmp.ge.s32.totalorder %s837_s18, 2 }
 0x170   : > { %s415_s12 = scalar_lea.sflag [#allocation4], %s414_s10 }
 0x171   : > { %p594_p11 = pnand %p1093_p10, %p943_p6 }
 0x173   : > { %p595_p12 = pneg %p594_p11 }
 0x175   : > { %820 = dma.done.wait (%p595_p12), %s415_s12, 128  }
 0x176   : > { %822 = vsyncadd (%p595_p12), %s415_s12, 4294967168  ;;  %s1094_s26 = sld [smem:[#allocation16_spill]]  ;;  %p23_p2 = scmp.ge.s32.totalorder %s911_s29, 4  }
 0x177   : > { %s1095_s17 = sld [smem:[#allocation17_spill]]  ;;  %s1096_s15 = smov %s829_s16 }
 0x178   : > { %s1098_s18 = smov %s911_s29  ;;  %25 = sbr.rel (!%p23_p2) target bundleno = 11 (0xb), region = 111 }
 0x17c   : > { %s1097_s16 = smov %s1094_s26 }
 0x17d   :  { %421 = vsyncpa [#allocation3], 1 }
 0x17e   :  { %423 = vsyncpa [#allocation3 + $0x1], 1 }
 0x17f   :  { %424 = vsyncpa [#allocation6], 1 }
 0x180   :  { %426 = vsyncpa [#allocation6 + $0x1], 1 }
 0x181   :  { %427 = vsyncpa [#allocation9], 1 }
 0x182   :  { %429 = vsyncpa [#allocation9 + $0x1], 1 }
 0x183   :  { %430 = vsyncpa [#allocation4], 1 }
 0x184   :  { %432 = vsyncpa [#allocation4 + $0x1], 1 }

</bundles_post_ra>
